<compile_context>
chip_gen: v5e
topology: v5e:2x2
jax: 0.10.0
libtpu: 0.0.40
codegen_flags: <defaults>
</compile_context>

<pallas_src>
import math
import jax
import jax.numpy as jnp
from jax.experimental import pallas as pl
from jax.experimental.pallas import tpu as pltpu


# ------------------------------ fused kernel ---------------------------------

def _make_fused_kernel(num_layers, batch_tile, n_nodes, f_out, compute_dtype):
    """Build a kernel that runs all GCNL layers for one batch tile.

    Ref layout (inputs then output):
      x_ref : (batch_tile*N, C0)      batch elements stacked along rows
      a_ref : (N, N)
      then per layer l: w_ref (C_l, 2F)  [W1|W2],  b_ref (1, 2F)  [b1|b2]
      out_ref : (batch_tile*N, F)     final running max over layers
    """

    def kernel(x_ref, a_ref, *rest):
        out_ref = rest[-1]
        a = a_ref[...].astype(compute_dtype)          # (N, N), VMEM-resident
        x = x_ref[...].astype(compute_dtype)          # (BT*N, C0)
        running = None
        for l in range(num_layers):                   # static unroll over layers
            w = rest[2 * l][...].astype(compute_dtype)      # (C_l, 2F)
            b = rest[2 * l + 1][...]                        # (1, 2F), f32
            # Reassociated: apply A once per batch block (A @ X_b), f32 accum.
            ax_blocks = [
                jnp.dot(a, x[bt * n_nodes:(bt + 1) * n_nodes, :],
                        preferred_element_type=jnp.float32)
                for bt in range(batch_tile)
            ]
            ax = (ax_blocks[0] if batch_tile == 1
                  else jnp.concatenate(ax_blocks, axis=0))  # (BT*N, C_l)
            # Single fused projection for both gates: (BT*N, C_l) @ (C_l, 2F).
            s = jnp.dot(ax.astype(compute_dtype), w,
                        preferred_element_type=jnp.float32) + b
            lhs = s[:, :f_out]
            rhs = s[:, f_out:]
            y = lhs * jax.nn.sigmoid(rhs)                   # (BT*N, F), f32
            running = y if running is None else jnp.maximum(running, y)
            x = y.astype(compute_dtype)                     # next layer input
        out_ref[...] = running.astype(out_ref.dtype)

    return kernel


# ------------------------------ block forward --------------------------------

def gcn_block_single(X, A, params, *, batch_tile=1, mxu_dtype=jnp.float32):
    """Pallas-backed GCNBlock_Single.forward.

    X: (B, N, C) float32;  A: (N, N);  params: list of (W1, b1, W2, b2).
    batch_tile: batch elements processed per grid step (grid is "parallel").
    mxu_dtype: set to jnp.bfloat16 on v6e/v7x for 2x MXU rate (f32 accumulate).
    """
    B, N, C0 = X.shape
    F = params[0][0].shape[1]
    L = len(params)
    # torch.stack(...).max(0) in the module requires equal filter sizes.
    assert all(W1.shape[1] == F and W2.shape[1] == F for (W1, _, W2, _) in params), \
        "GCNBlock_Single requires all filters equal for the final max"
    assert B % batch_tile == 0, "batch must be divisible by batch_tile"

    # Concatenate the two gate projections per layer: one matmul instead of two.
    wb = []
    for (W1, b1, W2, b2) in params:
        Wcat = jnp.concatenate([W1, W2], axis=1).astype(mxu_dtype)        # (C_l, 2F)
        bcat = jnp.concatenate([b1, b2]).reshape(1, 2 * F).astype(jnp.float32)
        wb += [Wcat, bcat]

    # Fold batch along rows: (B, N, C) -> (B*N, C) (pure reshape, batch-major).
    X_rows = X.reshape(B * N, C0).astype(mxu_dtype)
    A_in = A.astype(mxu_dtype)

    grid = (B // batch_tile,)
    in_specs = [
        pl.BlockSpec((batch_tile * N, C0), lambda i: (i, 0)),   # X batch tile
        pl.BlockSpec((N, N), lambda i: (0, 0)),                 # A, reused/resident
    ]
    for arr in wb:                                              # weights & biases
        in_specs.append(pl.BlockSpec(arr.shape, lambda i: (0, 0)))

    out = pl.pallas_call(
        _make_fused_kernel(L, batch_tile, N, F, mxu_dtype),
        out_shape=jax.ShapeDtypeStruct((B * N, F), jnp.float32),
        grid=grid,
        in_specs=in_specs,
        out_specs=pl.BlockSpec((batch_tile * N, F), lambda i: (i, 0)),
        compiler_params=pltpu.CompilerParams(
            dimension_semantics=("parallel",),          # v7x: shard batch over 2 TCs
            vmem_limit_bytes=32 * 1024 * 1024,
        ),
    )(X_rows, A_in, *wb)
    # TODO(synk): for very large N, tile A over row blocks (extra "arbitrary"
    # grid axis) instead of keeping the full (N, N) matrix VMEM-resident.
    return out.reshape(B, N, F)


# ----------------------- parameter init (matches PyTorch reset_parameters) ----

def init_gcn_params(key, in_f, out_f):
    stvd = 1.0 / math.sqrt(out_f)
    k_w, k_b = jax.random.split(key)
    W = jax.random.uniform(k_w, (in_f, out_f), jnp.float32, -stvd, stvd)
    b = jax.random.uniform(k_b, (out_f,), jnp.float32, -stvd, stvd)
    return W, b


def init_gcn_block_params(key, num_of_feature, filters):
    params = []
    c = num_of_feature
    for f in filters:
        key, k1, k2 = jax.random.split(key, 3)
        W1, b1 = init_gcn_params(k1, c, f)   # gcn1
        W2, b2 = init_gcn_params(k2, c, f)   # gcn2
        params.append((W1, b1, W2, b2))
        c = f
    return params


# ------------------------------ pure-JAX reference ----------------------------

def ref_gcn_block_single(X, A, params):
    """Mirrors the PyTorch module exactly: A @ (X @ W) + b, gated, max-stacked."""
    outs = []
    for (W1, b1, W2, b2) in params:
        lhs = jnp.einsum('nm,bmf->bnf', A, jnp.einsum('bnc,cf->bnf', X, W1)) + b1
        rhs = jnp.einsum('nm,bmf->bnf', A, jnp.einsum('bnc,cf->bnf', X, W2)) + b2
        X = lhs * jax.nn.sigmoid(rhs)
        outs.append(X)
    return jnp.max(jnp.stack(outs), axis=0)


if __name__ == "__main__":
    key = jax.random.PRNGKey(0)
    B, N, C = 2, 16, 8
    filters = [8, 8]   # the module's max-stack requires equal filter sizes

    k_x, k_a, k_p = jax.random.split(key, 3)
    X = jax.random.normal(k_x, (B, N, C), jnp.float32)
    A = jax.random.normal(k_a, (N, N), jnp.float32)
    params = init_gcn_block_params(k_p, C, filters)

    ref = ref_gcn_block_single(X, A, params)

    # batch_tile=1: grid=(B,) "parallel" (v7x gets one batch per TensorCore).
    out = gcn_block_single(X, A, params, batch_tile=1)
    out = jax.block_until_ready(out)
    assert out.shape == (B, N, filters[-1])
    assert jnp.allclose(out, ref, atol=1e-4, rtol=1e-4), "mismatch vs reference (bt=1)"

    # batch_tile=B: whole batch folded into one wide matmul per layer, grid=(1,).
    out2 = gcn_block_single(X, A, params, batch_tile=B)
    out2 = jax.block_until_ready(out2)
    assert jnp.allclose(out2, ref, atol=1e-4, rtol=1e-4), "mismatch vs reference (bt=B)"

    print("KERNEL_OK")
</pallas_src>

<mosaic_0001>
module attributes {stable_mosaic.version = 11 : i64} {
  func.func @kernel(%arg0: i32, %arg1: memref<16x8xf32, #tpu.memory_space<vmem>>, %arg2: memref<16x16xf32, #tpu.memory_space<vmem>>, %arg3: memref<8x16xf32, #tpu.memory_space<vmem>>, %arg4: memref<1x16xf32, #tpu.memory_space<vmem>>, %arg5: memref<8x16xf32, #tpu.memory_space<vmem>>, %arg6: memref<1x16xf32, #tpu.memory_space<vmem>>, %arg7: memref<16x8xf32, #tpu.memory_space<vmem>>) attributes {dimension_semantics = [#tpu.dimension_semantics<parallel>], iteration_bounds = array<i64: 2>, scalar_prefetch = 0 : i64, scratch_operands = 0 : i64, tpu.core_type = #tpu.core_type<tc>, window_params = [{transform_indices = @transform_0, window_bounds = array<i64: 16, 8>}, {pipeline_mode = #tpu.pipeline_mode<synchronous>, transform_indices = @transform_1, window_bounds = array<i64: 16, 16>}, {pipeline_mode = #tpu.pipeline_mode<synchronous>, transform_indices = @transform_2, window_bounds = array<i64: 8, 16>}, {pipeline_mode = #tpu.pipeline_mode<synchronous>, transform_indices = @transform_3, window_bounds = array<i64: 1, 16>}, {pipeline_mode = #tpu.pipeline_mode<synchronous>, transform_indices = @transform_4, window_bounds = array<i64: 8, 16>}, {pipeline_mode = #tpu.pipeline_mode<synchronous>, transform_indices = @transform_5, window_bounds = array<i64: 1, 16>}, {transform_indices = @transform_6, window_bounds = array<i64: 16, 8>}]} {
    %c0 = arith.constant 0 : index
    %c0_0 = arith.constant 0 : index
    %0 = vector.load %arg2[%c0, %c0_0] : memref<16x16xf32, #tpu.memory_space<vmem>>, vector<16x16xf32>
    %c0_1 = arith.constant 0 : index
    %c0_2 = arith.constant 0 : index
    %1 = vector.load %arg1[%c0_1, %c0_2] : memref<16x8xf32, #tpu.memory_space<vmem>>, vector<16x8xf32>
    %c0_3 = arith.constant 0 : index
    %c0_4 = arith.constant 0 : index
    %2 = vector.load %arg3[%c0_3, %c0_4] : memref<8x16xf32, #tpu.memory_space<vmem>>, vector<8x16xf32>
    %c0_5 = arith.constant 0 : index
    %c0_6 = arith.constant 0 : index
    %3 = vector.load %arg4[%c0_5, %c0_6] : memref<1x16xf32, #tpu.memory_space<vmem>>, vector<1x16xf32>
    %cst = arith.constant dense<0.000000e+00> : vector<16x8xf32>
    %4 = tpu.matmul %0, %1, %cst {dimension_numbers = #tpu.dot_dimension_numbers<[1], [0], [0], [1], [0, 0, 1, 1], [], []>} : vector<16x16xf32>, vector<16x8xf32>, vector<16x8xf32> -> vector<16x8xf32>
    %cst_7 = arith.constant dense<0.000000e+00> : vector<16x16xf32>
    %5 = tpu.matmul %4, %2, %cst_7 {dimension_numbers = #tpu.dot_dimension_numbers<[1], [0], [0], [1], [0, 0, 1, 1], [], []>} : vector<16x8xf32>, vector<8x16xf32>, vector<16x16xf32> -> vector<16x16xf32>
    %6 = vector.broadcast %3 : vector<1x16xf32> to vector<16x16xf32>
    %7 = arith.addf %5, %6 : vector<16x16xf32>
    %8 = vector.extract_strided_slice %7 {offsets = [0, 0], sizes = [16, 8], strides = [1, 1]} : vector<16x16xf32> to vector<16x8xf32>
    %9 = vector.extract_strided_slice %7 {offsets = [0, 8], sizes = [16, 8], strides = [1, 1]} : vector<16x16xf32> to vector<16x8xf32>
    %10 = arith.negf %9 : vector<16x8xf32>
    %11 = math.exp %10 : vector<16x8xf32>
    %cst_8 = arith.constant 1.000000e+00 : f32
    %12 = vector.broadcast %cst_8 : f32 to vector<16x8xf32>
    %13 = arith.addf %12, %11 : vector<16x8xf32>
    %14 = arith.divf %12, %13 : vector<16x8xf32>
    %15 = arith.mulf %8, %14 : vector<16x8xf32>
    %c0_9 = arith.constant 0 : index
    %c0_10 = arith.constant 0 : index
    %16 = vector.load %arg5[%c0_9, %c0_10] : memref<8x16xf32, #tpu.memory_space<vmem>>, vector<8x16xf32>
    %c0_11 = arith.constant 0 : index
    %c0_12 = arith.constant 0 : index
    %17 = vector.load %arg6[%c0_11, %c0_12] : memref<1x16xf32, #tpu.memory_space<vmem>>, vector<1x16xf32>
    %cst_13 = arith.constant dense<0.000000e+00> : vector<16x8xf32>
    %18 = tpu.matmul %0, %15, %cst_13 {dimension_numbers = #tpu.dot_dimension_numbers<[1], [0], [0], [1], [0, 0, 1, 1], [], []>} : vector<16x16xf32>, vector<16x8xf32>, vector<16x8xf32> -> vector<16x8xf32>
    %cst_14 = arith.constant dense<0.000000e+00> : vector<16x16xf32>
    %19 = tpu.matmul %18, %16, %cst_14 {dimension_numbers = #tpu.dot_dimension_numbers<[1], [0], [0], [1], [0, 0, 1, 1], [], []>} : vector<16x8xf32>, vector<8x16xf32>, vector<16x16xf32> -> vector<16x16xf32>
    %20 = vector.broadcast %17 : vector<1x16xf32> to vector<16x16xf32>
    %21 = arith.addf %19, %20 : vector<16x16xf32>
    %22 = vector.extract_strided_slice %21 {offsets = [0, 0], sizes = [16, 8], strides = [1, 1]} : vector<16x16xf32> to vector<16x8xf32>
    %23 = vector.extract_strided_slice %21 {offsets = [0, 8], sizes = [16, 8], strides = [1, 1]} : vector<16x16xf32> to vector<16x8xf32>
    %24 = arith.negf %23 : vector<16x8xf32>
    %25 = math.exp %24 : vector<16x8xf32>
    %cst_15 = arith.constant 1.000000e+00 : f32
    %26 = vector.broadcast %cst_15 : f32 to vector<16x8xf32>
    %27 = arith.addf %26, %25 : vector<16x8xf32>
    %28 = arith.divf %26, %27 : vector<16x8xf32>
    %29 = arith.mulf %22, %28 : vector<16x8xf32>
    %30 = arith.maximumf %15, %29 : vector<16x8xf32>
    %c0_16 = arith.constant 0 : index
    %c0_17 = arith.constant 0 : index
    %31 = vector.load %arg7[%c0_16, %c0_17] : memref<16x8xf32, #tpu.memory_space<vmem>>, vector<16x8xf32>
    tpu.vector_store %arg7[%c0_16, %c0_17], %30 {strides = array<i32>} : memref<16x8xf32, #tpu.memory_space<vmem>>, vector<16x8xf32>,
    return
  }
  func.func @transform_0(%arg0: i32) -> (i32, i32) {
    %c0_i32 = arith.constant 0 : i32
    %c0_i32_0 = arith.constant 0 : i32
    return %arg0, %c0_i32 : i32, i32
  }
  func.func @transform_1(%arg0: i32) -> (i32, i32) {
    %c0_i32 = arith.constant 0 : i32
    %c0_i32_0 = arith.constant 0 : i32
    %c0_i32_1 = arith.constant 0 : i32
    return %c0_i32, %c0_i32_0 : i32, i32
  }
  func.func @transform_2(%arg0: i32) -> (i32, i32) {
    %c0_i32 = arith.constant 0 : i32
    %c0_i32_0 = arith.constant 0 : i32
    %c0_i32_1 = arith.constant 0 : i32
    return %c0_i32, %c0_i32_0 : i32, i32
  }
  func.func @transform_3(%arg0: i32) -> (i32, i32) {
    %c0_i32 = arith.constant 0 : i32
    %c0_i32_0 = arith.constant 0 : i32
    %c0_i32_1 = arith.constant 0 : i32
    return %c0_i32, %c0_i32_0 : i32, i32
  }
  func.func @transform_4(%arg0: i32) -> (i32, i32) {
    %c0_i32 = arith.constant 0 : i32
    %c0_i32_0 = arith.constant 0 : i32
    %c0_i32_1 = arith.constant 0 : i32
    return %c0_i32, %c0_i32_0 : i32, i32
  }
  func.func @transform_5(%arg0: i32) -> (i32, i32) {
    %c0_i32 = arith.constant 0 : i32
    %c0_i32_0 = arith.constant 0 : i32
    %c0_i32_1 = arith.constant 0 : i32
    return %c0_i32, %c0_i32_0 : i32, i32
  }
  func.func @transform_6(%arg0: i32) -> (i32, i32) {
    %c0_i32 = arith.constant 0 : i32
    %c0_i32_0 = arith.constant 0 : i32
    return %arg0, %c0_i32 : i32, i32
  }
}

</mosaic_0001>

<bundles_post_ra>
// kernel: tpu_custom_call.1
= control target key start
LH: loop header
LB: loop body
LE: loop exit
PB: predicated region body
PF: predicated region fallthrough
CT: control target
= control target key end

     0   :  { %s631_s21 = smov 0   ;;  %s695_s0 = inlined_call_operand.vmem [shape: f32[32,8], index: 0, kind: input, shape index: {}]   ;;  %s696_s1 = inlined_call_operand.vmem [shape: f32[16,16], index: 1, kind: input, shape index: {}]   ;;  %s697_s2 = inlined_call_operand.vmem [shape: f32[8,16], index: 2, kind: input, shape index: {}]   ;;  %s698_s3 = inlined_call_operand.vmem [shape: f32[1,16], index: 3, kind: input, shape index: {}]   ;;  %s699_s4 = inlined_call_operand.vmem [shape: f32[8,16], index: 4, kind: input, shape index: {}]   ;;  %s700_s5 = inlined_call_operand.vmem [shape: f32[1,16], index: 5, kind: input, shape index: {}]   ;;  %s701_s6 = inlined_call_operand.vmem [shape: f32[32,8], index: 6, kind: output, shape index: {}]  }
   0x1 LB: > { %s537_s22 = sadd.s32 4294967295, %s593_s21   ;;  %p541_p0 = scmp.ge.s32.totalorder %s593_s21, 1  ;;  %s593_s21 = sphi %s631_s21, %s16_s21  }
   0x2   : > { %p213_p1 = scmp.lt.s32.totalorder %s593_s21, 3 }
   0x4   : > { %p214_p2 = pnand %p541_p0, %p213_p1 }
   0x5   : > { %s542_s23 = sshll.u32 (!%p214_p2), %s537_s22, 1  ;;  %s595_s12 = smov (!%p214_p2), 120  }
   0x6   : > { %217 = sbr.rel (%p214_p2) target bundleno = 856 (0x358), region = 44  ;;  %p244_p3 = scmp.lt.s32.totalorder (!%p214_p2), %s542_s23, 3 }
   0xb   : > { %s703_s23 = smov (!%p244_p3, %s542_s23), 3  ;;  %v650_v2 = vld [vmem:[%s696_s1] sm:$0xff]  ;;  %vm261_vm0 = vcmask 130048   ;;  %v256_v3 = vld [vmem:[%s696_s1 + $0x8] sm:$0xff]  ;;  %vm294_vm1 = vcmask 64512  }
   0xc   : > { %s543_s24 = sshll.u32 %s703_s23, 3  ;;  %v259_v4 = vld [vmem:[%s697_s2] sm:$0xff] }
   0xd   : > { %s247_s27 = scalar_lea.vmem %s695_s0, %s543_s24  ;;  %316 = vmatpush.msra.mxu1 %v259_v4  ;;  %v569_v7 = vld [vmem:[%s698_s3] ss:$0 sm:$0xff]  ;;  %s253_s19 = scalar_lea.vmem %s701_s6, %s543_s24 }
   0xe   : > { %v258_v0 = vld [vmem:[%s247_s27 + $0x8] sm:$0xff]  ;;  %v257_v1 = vld [vmem:[%s247_s27] sm:$0xff] }
   0xf   : > { %282 = vmatpush.msra.mxu0 %v258_v0  ;;  %v372_v42 = vld [vmem:[%s699_s4] sm:$0xff] }
  0x10   : > { %421 = vmatpush.msra.mxu3 %v372_v42  ;;  %v570_v45 = vld [vmem:[%s700_s5] ss:$0 sm:$0xff] }
  0x11   : > { %283 = vmatpush.msra.mxu0 %v257_v1 }
  0x12   : > { %546 = vmatmul.msk.f32.vlgmr.msra.gmra.mxu0 %vm261_vm0, %v650_v2 }
  0x1a   : > { %547 = vmatmul.msk.f32.gmra.mxu0 %vm261_vm0, %v256_v3 }
  0x8f   : > { %v285_v5 = vpop.f32.mrf.mxu0 }
  0x90   : > { %548 = vmatmul.msk.f32.vlgmr.msra.gmra.mxu1 %vm294_vm1, %v285_v5 }
  0x97   : > { %v288_v6 = vpop.f32.mrf.mxu0 }
  0x98   : > { %549 = vmatmul.msk.f32.gmra.mxu1 %vm294_vm1, %v288_v6 }
 0x10d   : > { %v318_v8 = vpop.f32.mrf.mxu1 }
 0x10e   : > { %v319_v9 = vadd.f32 %v569_v7, %v318_v8 }
 0x110   : > { %v550_v10 = vmul.f32 -1.442695, %v319_v9 }
 0x112   : > { %571 = vpow2.f32 %v550_v10 }
 0x115   : > { %v321_v11 = vpop.f32.mrf.mxu1 }
 0x116   : > { %v322_v12 = vadd.f32 %v569_v7, %v321_v11 }
 0x118   : > { %v572_v13 = vpop.eup %571  ;;  %v551_v14 = vmul.f32 -1.442695, %v322_v12 }
 0x119   : > { %v330_v15 = vadd.f32 1.0, %v572_v13 }
 0x11a   : > { %573 = vpow2.f32 %v551_v14 }
 0x11b   : > { %575 = vrcp.f32 %v330_v15  ;;  %v343_v33 = vand.u32 2147483648, %v330_v15  ;;  %vm337_vm7 = vweird.f32 %v330_v15  ;;  %v341_v34 = vand.u32 2147483647, %v330_v15 }
 0x11d   : > { %v344_v36 = vor.u32 1.1754944e-38, %v343_v33  ;;  %vm342_vm9 = vcmp.eq.f32.partialorder %v341_v34, 8.507059e+37 }
 0x120   : > { %v574_v16 = vpop.eup %573 }
 0x121   : > { %v331_v17 = vadd.f32 1.0, %v574_v16  ;;  %v576_v18 = vpop.eup %575 }
 0x122   : > { %v333_v19 = vmul.f32 %v576_v18, %v330_v15  ;;  %vm338_vm6 = vweird.f32 %v576_v18 }
 0x123   : > { %577 = vrcp.f32 %v331_v17  ;;  %v358_v24 = vand.u32 2147483648, %v331_v17  ;;  %v356_v26 = vand.u32 2147483647, %v331_v17  ;;  %vm352_vm3 = vweird.f32 %v331_v17  ;;  %vm339_vm8 = vmor %vm337_vm7, %vm338_vm6 }
 0x124   : > { %v334_v23 = vsub.f32 1.0, %v333_v19 }
 0x125   : > { %v359_v29 = vor.u32 1.1754944e-38, %v358_v24  ;;  %vm357_vm5 = vcmp.eq.f32.partialorder %v356_v26, 8.507059e+37 }
 0x126   : > { %v335_v28 = vmul.f32 %v576_v18, %v334_v23 }
 0x128   : > { %v336_v32 = vadd.f32 %v576_v18, %v335_v28 }
 0x129   : > { %v578_v20 = vpop.eup %577 }
 0x12a   : > { %v348_v21 = vmul.f32 %v578_v20, %v331_v17  ;;  %vm353_vm2 = vweird.f32 %v578_v20  ;;  %v340_v35 = vsel %vm339_vm8, %v576_v18, %v336_v32 }
 0x12b   : > { %vm354_vm4 = vmor %vm352_vm3, %vm353_vm2  ;;  %v345_v37 = vsel %vm342_vm9, %v344_v36, %v340_v35 }
 0x12c   : > { %v349_v22 = vsub.f32 1.0, %v348_v21 }
 0x12e   : > { %v350_v25 = vmul.f32 %v578_v20, %v349_v22 }
 0x130   : > { %v351_v27 = vadd.f32 %v578_v20, %v350_v25 }
 0x132   : > { %v355_v30 = vsel %vm354_vm4, %v578_v20, %v351_v27 }
 0x133   : > { %v360_v31 = vsel %vm357_vm5, %v359_v29, %v355_v30 }
 0x134   : > { %366 = vrot.lane.b32.xlu0 %v360_v31, %s595_s12 }
 0x13c   : > { %364 = vrot.lane.b32.xlu0 %v345_v37, %s595_s12 }
 0x1a6   : > { %v367_v38 = vpop.permute.xlu0 %366 }
 0x1a7   : > { %v668_v39 = vmul.f32 %v367_v38, %v322_v12 }
 0x1a9   : > { %388 = vmatpush.msra.mxu2 %v668_v39 }
 0x1ae   : > { %v365_v40 = vpop.permute.xlu0 %364 }
 0x1af   : > { %v370_v41 = vmul.f32 %v365_v40, %v319_v9 }
 0x1b1   : > { %389 = vmatpush.msra.mxu2 %v370_v41 }
 0x1b2   : > { %552 = vmatmul.msk.f32.vlgmr.msra.gmra.mxu2 %vm261_vm0, %v650_v2 }
 0x1ba   : > { %553 = vmatmul.msk.f32.gmra.mxu2 %vm261_vm0, %v256_v3 }
 0x235   : > { %v391_v43 = vpop.f32.mrf.mxu2 }
 0x236   : > { %554 = vmatmul.msk.f32.vlgmr.msra.gmra.mxu3 %vm294_vm1, %v391_v43 }
 0x23d   : > { %v394_v44 = vpop.f32.mrf.mxu2 }
 0x23e   : > { %555 = vmatmul.msk.f32.gmra.mxu3 %vm294_vm1, %v394_v44 }
 0x2b9   : > { %v423_v46 = vpop.f32.mrf.mxu3 }
 0x2ba   : > { %v424_v47 = vadd.f32 %v570_v45, %v423_v46 }
 0x2bc   : > { %v556_v48 = vmul.f32 -1.442695, %v424_v47 }
 0x2be   : > { %579 = vpow2.f32 %v556_v48 }
 0x2c1   : > { %v426_v49 = vpop.f32.mrf.mxu3 }
 0x2c2   : > { %v427_v50 = vadd.f32 %v570_v45, %v426_v49 }
 0x2c4   : > { %v580_v51 = vpop.eup %579  ;;  %v557_v52 = vmul.f32 -1.442695, %v427_v50 }
 0x2c5   : > { %v435_v53 = vadd.f32 1.0, %v580_v51 }
 0x2c6   : > { %581 = vpow2.f32 %v557_v52 }
 0x2c7   : > { %583 = vrcp.f32 %v435_v53  ;;  %v448_v59 = vand.u32 2147483648, %v435_v53  ;;  %v446_v61 = vand.u32 2147483647, %v435_v53  ;;  %vm442_vm11 = vweird.f32 %v435_v53 }
 0x2c9   : > { %v449_v0 = vor.u32 1.1754944e-38, %v448_v59  ;;  %vm447_vm13 = vcmp.eq.f32.partialorder %v446_v61, 8.507059e+37 }
 0x2cc   : > { %v582_v54 = vpop.eup %581 }
 0x2cd   : > { %v584_v55 = vpop.eup %583  ;;  %v436_v56 = vadd.f32 1.0, %v582_v54 }
 0x2ce   : > { %v438_v57 = vmul.f32 %v584_v55, %v435_v53  ;;  %vm443_vm10 = vweird.f32 %v584_v55 }
 0x2cf   : > { %585 = vrcp.f32 %v436_v56  ;;  %vm444_vm12 = vmor %vm442_vm11, %vm443_vm10  ;;  %v463_v5 = vand.u32 2147483648, %v436_v56  ;;  %v461_v7 = vand.u32 2147483647, %v436_v56  ;;  %vm457_vm15 = vweird.f32 %v436_v56 }
 0x2d0   : > { %v439_v58 = vsub.f32 1.0, %v438_v57 }
 0x2d1   : > { %v464_v9 = vor.u32 1.1754944e-38, %v463_v5  ;;  %vm462_vm2 = vcmp.eq.f32.partialorder %v461_v7, 8.507059e+37 }
 0x2d2   : > { %v440_v60 = vmul.f32 %v584_v55, %v439_v58 }
 0x2d4   : > { %v441_v62 = vadd.f32 %v584_v55, %v440_v60 }
 0x2d5   : > { %v586_v63 = vpop.eup %585 }
 0x2d6   : > { %v445_v1 = vsel %vm444_vm12, %v584_v55, %v441_v62  ;;  %v453_v2 = vmul.f32 %v586_v63, %v436_v56  ;;  %vm458_vm14 = vweird.f32 %v586_v63 }
 0x2d7   : > { %v450_v3 = vsel %vm447_vm13, %v449_v0, %v445_v1  ;;  %vm459_vm0 = vmor %vm457_vm15, %vm458_vm14 }
 0x2d8   : > { %469 = vrot.lane.b32.xlu1 %v450_v3, %s595_s12  ;;  %v454_v4 = vsub.f32 1.0, %v453_v2 }
 0x2da   : > { %v455_v6 = vmul.f32 %v586_v63, %v454_v4 }
 0x2dc   : > { %v456_v8 = vadd.f32 %v586_v63, %v455_v6 }
 0x2de   : > { %v460_v10 = vsel %vm459_vm0, %v586_v63, %v456_v8 }
 0x2df   : > { %v465_v11 = vsel %vm462_vm2, %v464_v9, %v460_v10 }
 0x2e0   : > { %471 = vrot.lane.b32.xlu1 %v465_v11, %s595_s12 }
 0x34a   : > { %v470_v12 = vpop.permute.xlu1 %469 }
 0x34b   : > { %v475_v13 = vmul.f32 %v470_v12, %v424_v47 }
 0x34d   : > { %v477_v14 = vmax.f32 %v370_v41, %v475_v13 }
 0x34f   : > { %479 = vst.msk [vmem:[%s253_s19] sm:$0xff] %vm294_vm1, %v477_v14 }
 0x352   : > { %v472_v15 = vpop.permute.xlu1 %471 }
 0x353   : > { %v476_v16 = vmul.f32 %v472_v15, %v427_v50 }
 0x355   : > { %v478_v17 = vmax.f32 %v668_v39, %v476_v16 }
 0x357   : > { %480 = vst.msk [vmem:[%s253_s19 + $0x8] sm:$0xff] %vm294_vm1, %v478_v17 }
 0x358 PF: > { %s16_s21 = sadd.s32 1, %s593_s21  }
 0x359   : > { %p13_p4 = scmp.ge.s32.totalorder %s16_s21, 4  }
 0x35b   :  { %15 = sbr.rel (!%p13_p4) target bundleno = 1 (0x1), region = 74 }

</bundles_post_ra>
